<compile_context>
chip_gen: v7x
topology: tpu7x:2x2x1
jax: 0.10.0
libtpu: 0.0.40
codegen_flags: <defaults>
</compile_context>

<pallas_src>
import functools

import jax
import jax.numpy as jnp
from jax import lax
from jax.experimental import pallas as pl
from jax.experimental.pallas import tpu as pltpu


def _evonorm_act_kernel(x_ref, v_ref, w_ref, b_ref, o_ref, *, eps):
    x = x_ref[...]                                   # (TB, G, D)
    inv_count = 1.0 / float(x.shape[-1])

    v = v_ref[...].astype(x.dtype)                   # (1, G, D) -> broadcasts on TB
    n = x * jax.nn.sigmoid(x * v)                    # one EUP transcendental / elem

    # Single-pass population variance per (batch, group), f32 accumulation.
    # (E[x^2] - mean^2 is slightly less stable than two-pass when |mean| >> std;
    # acceptable for activation statistics and matches torch.var(unbiased=False).)
    xf = x.astype(jnp.float32)
    mean = jnp.sum(xf, axis=-1, keepdims=True) * inv_count        # (TB, G, 1)
    ex2 = jnp.sum(xf * xf, axis=-1, keepdims=True) * inv_count    # (TB, G, 1)
    var = ex2 - mean * mean
    inv_std = lax.rsqrt(var + eps).astype(x.dtype)                # (TB, G, 1)

    w = w_ref[...].astype(x.dtype)
    b = b_ref[...].astype(x.dtype)
    o_ref[...] = ((n * inv_std) * w + b).astype(o_ref.dtype)


def _evonorm_affine_kernel(x_ref, w_ref, b_ref, o_ref):
    x = x_ref[...]                                   # (TB, G, D)
    w = w_ref[...].astype(x.dtype)
    b = b_ref[...].astype(x.dtype)
    o_ref[...] = (x * w + b).astype(o_ref.dtype)


def _cdiv(a, b):
    return -(-a // b)


def _vmem_capacity_bytes():
    try:
        return int(pltpu.get_tpu_info().vmem_capacity_bytes)
    except Exception:
        return 64 * 1024 * 1024   # conservative fallback (v7x-sized VMEM)


def _pick_batch_tile(batch, per_batch_bytes, target_bytes):
    """Batch tile targeting ~target_bytes per x-block; no divisor constraint (cdiv grid)."""
    tb = max(1, min(batch, target_bytes // max(per_batch_bytes, 1)))
    if batch >= 2:
        # Keep at least 2 grid steps so the 'parallel' batch axis can be sharded
        # across both TensorCores on v7x (one extra ~0.35us step elsewhere: noise).
        tb = min(tb, _cdiv(batch, 2))
    return int(tb)


def evonorm_sample2d(x, weight, bias, v=None, *, groups=8, eps=1e-5, apply_act=True):
    """x: (B, C, H, W); weight/bias/v: (1, C, 1, 1). Returns (B, C, H, W)."""
    B, C, H, W = x.shape
    assert C % groups == 0, "C must be divisible by groups"
    G = groups
    Cg = C // G
    HW = H * W
    D = Cg * HW

    x3 = x.reshape(B, G, D)

    def _param(p):
        # (1, C, 1, 1) -> per-channel value broadcast across its H*W span -> (1, G, D).
        return jnp.broadcast_to(p.reshape(G, Cg, 1), (G, Cg, HW)).reshape(1, G, D)

    w_p = _param(weight)
    b_p = _param(bias)

    itemsize = x.dtype.itemsize
    per_batch_bytes = G * D * itemsize

    # Generation-aware block target + VMEM budget.
    vmem_cap = _vmem_capacity_bytes()
    if vmem_cap >= (100 << 20):        # v5e / v6e: 128 MiB physical VMEM
        target_block = 8 << 20
        budget_cap = 96 << 20
    else:                               # v7x: 64 MiB physical VMEM per TensorCore
        target_block = 4 << 20
        budget_cap = 46 << 20

    TB = _pick_batch_tile(B, per_batch_bytes, target_block)
    grid = (_cdiv(B, TB),)
    block = (TB, G, D)
    block_bytes = TB * per_batch_bytes
    # TODO(synk): if a single batch row is already huge (per_batch_bytes >> target_block),
    # chunk the D axis with an in-kernel loop (sum / sum-of-squares accumulation, then a
    # second normalize+store pass) instead of loading the whole group row at once.

    # Live-set estimate: 2x(in + out) pipeline buffers, ~3 block-sized f32 temporaries,
    # double-buffered resident params, plus headroom for Mosaic internal scratch;
    # clamped to the per-generation budget above.
    f32_block = TB * G * D * 4
    param_vmem = 2 * 3 * G * D * 4
    need = 4 * block_bytes + 3 * f32_block + param_vmem + (2 << 20)
    vmem_limit = int(min(budget_cap, max(need, 16 << 20)))

    n_elems = B * C * H * W
    cost = pl.CostEstimate(
        flops=(9 if apply_act else 2) * n_elems,
        transcendentals=(n_elems if apply_act else 0),
        bytes_accessed=2 * n_elems * itemsize + 3 * G * D * weight.dtype.itemsize,
    )

    x_spec = pl.BlockSpec(block, lambda i: (i, 0, 0))
    p_spec = pl.BlockSpec((1, G, D), lambda i: (0, 0, 0))   # resident in VMEM
    out_spec = pl.BlockSpec(block, lambda i: (i, 0, 0))
    cparams = pltpu.CompilerParams(
        dimension_semantics=("parallel",),
        vmem_limit_bytes=vmem_limit,
    )

    if apply_act:
        assert v is not None, "v is required when apply_act=True"
        v_p = _param(v)
        out = pl.pallas_call(
            functools.partial(_evonorm_act_kernel, eps=eps),
            out_shape=jax.ShapeDtypeStruct((B, G, D), x.dtype),
            grid_spec=pltpu.PrefetchScalarGridSpec(
                num_scalar_prefetch=0,
                grid=grid,
                in_specs=[x_spec, p_spec, p_spec, p_spec],
                out_specs=out_spec,
            ),
            compiler_params=cparams,
            cost_estimate=cost,
        )(x3, v_p, w_p, b_p)
    else:
        out = pl.pallas_call(
            _evonorm_affine_kernel,
            out_shape=jax.ShapeDtypeStruct((B, G, D), x.dtype),
            grid_spec=pltpu.PrefetchScalarGridSpec(
                num_scalar_prefetch=0,
                grid=grid,
                in_specs=[x_spec, p_spec, p_spec],
                out_specs=out_spec,
            ),
            compiler_params=cparams,
            cost_estimate=cost,
        )(x3, w_p, b_p)

    return out.reshape(B, C, H, W)


def _reference(x, weight, bias, v, *, groups=8, eps=1e-5, apply_act=True):
    B, C, H, W = x.shape
    out = x
    if apply_act:
        n = x * jax.nn.sigmoid(x * v)
        xg = x.reshape(B, groups, -1)
        var = jnp.var(xg, axis=-1, keepdims=True)  # unbiased=False equivalent
        out = (n.reshape(B, groups, -1) / jnp.sqrt(var + eps)).reshape(B, C, H, W)
    return out * weight + bias


if __name__ == "__main__":
    key = jax.random.PRNGKey(0)
    kx, kw, kb, kv = jax.random.split(key, 4)

    B, C, H, W = 2, 16, 16, 16
    groups = 8
    eps = 1e-5

    x = jax.random.normal(kx, (B, C, H, W), dtype=jnp.float32)

    # reset_parameters() init (ones / zeros / ones) plus a small deterministic
    # perturbation so the per-channel broadcast path is actually exercised.
    param_shape = (1, C, 1, 1)
    weight = jnp.ones(param_shape, jnp.float32) + 0.1 * jax.random.normal(kw, param_shape, jnp.float32)
    bias = jnp.zeros(param_shape, jnp.float32) + 0.1 * jax.random.normal(kb, param_shape, jnp.float32)
    v = jnp.ones(param_shape, jnp.float32) + 0.1 * jax.random.normal(kv, param_shape, jnp.float32)

    # apply_act=True path
    out = evonorm_sample2d(x, weight, bias, v, groups=groups, eps=eps, apply_act=True)
    out = jax.block_until_ready(out)
    ref = _reference(x, weight, bias, v, groups=groups, eps=eps, apply_act=True)
    assert jnp.allclose(out, ref, atol=1e-4, rtol=1e-4), "mismatch vs reference (apply_act=True)"

    # apply_act=False path (affine only, no v streamed)
    out2 = evonorm_sample2d(x, weight, bias, None, groups=groups, eps=eps, apply_act=False)
    out2 = jax.block_until_ready(out2)
    ref2 = _reference(x, weight, bias, v, groups=groups, eps=eps, apply_act=False)
    assert jnp.allclose(out2, ref2, atol=1e-4, rtol=1e-4), "mismatch vs reference (apply_act=False)"

    print("KERNEL_OK")
</pallas_src>

<mosaic_0001>
module attributes {stable_mosaic.version = 11 : i64} {
  func.func @_evonorm_act_kernel(%arg0: i32, %arg1: memref<1x8x512xf32, #tpu.memory_space<vmem>>, %arg2: memref<1x8x512xf32, #tpu.memory_space<vmem>>, %arg3: memref<1x8x512xf32, #tpu.memory_space<vmem>>, %arg4: memref<1x8x512xf32, #tpu.memory_space<vmem>>, %arg5: memref<1x8x512xf32, #tpu.memory_space<vmem>>) attributes {dimension_semantics = [#tpu.dimension_semantics<parallel>], iteration_bounds = array<i64: 2>, scalar_prefetch = 0 : i64, scratch_operands = 0 : i64, tpu.core_type = #tpu.core_type<tc>, window_params = [{transform_indices = @transform_0, window_bounds = array<i64: 1, 8, 512>}, {pipeline_mode = #tpu.pipeline_mode<synchronous>, transform_indices = @transform_1, window_bounds = array<i64: 1, 8, 512>}, {pipeline_mode = #tpu.pipeline_mode<synchronous>, transform_indices = @transform_2, window_bounds = array<i64: 1, 8, 512>}, {pipeline_mode = #tpu.pipeline_mode<synchronous>, transform_indices = @transform_3, window_bounds = array<i64: 1, 8, 512>}, {transform_indices = @transform_4, window_bounds = array<i64: 1, 8, 512>}]} {
    %c0 = arith.constant 0 : index
    %c0_0 = arith.constant 0 : index
    %c0_1 = arith.constant 0 : index
    %0 = vector.load %arg1[%c0, %c0_0, %c0_1] : memref<1x8x512xf32, #tpu.memory_space<vmem>>, vector<1x8x512xf32>
    %c0_2 = arith.constant 0 : index
    %c0_3 = arith.constant 0 : index
    %c0_4 = arith.constant 0 : index
    %1 = vector.load %arg2[%c0_2, %c0_3, %c0_4] : memref<1x8x512xf32, #tpu.memory_space<vmem>>, vector<1x8x512xf32>
    %2 = arith.mulf %0, %1 : vector<1x8x512xf32>
    %3 = arith.negf %2 : vector<1x8x512xf32>
    %4 = math.exp %3 : vector<1x8x512xf32>
    %cst = arith.constant 1.000000e+00 : f32
    %5 = vector.broadcast %cst : f32 to vector<1x8x512xf32>
    %6 = arith.addf %5, %4 : vector<1x8x512xf32>
    %7 = arith.divf %5, %6 : vector<1x8x512xf32>
    %8 = arith.mulf %0, %7 : vector<1x8x512xf32>
    %cst_5 = arith.constant dense<0.000000e+00> : vector<1x8xf32>
    %9 = vector.multi_reduction <add>, %0, %cst_5 [2] : vector<1x8x512xf32> to vector<1x8xf32>
    %10 = vector.shape_cast %9 : vector<1x8xf32> to vector<1x8x1xf32>
    %cst_6 = arith.constant 0.001953125 : f32
    %11 = vector.broadcast %cst_6 : f32 to vector<1x8x1xf32>
    %12 = arith.mulf %10, %11 : vector<1x8x1xf32>
    %13 = arith.mulf %0, %0 : vector<1x8x512xf32>
    %cst_7 = arith.constant dense<0.000000e+00> : vector<1x8xf32>
    %14 = vector.multi_reduction <add>, %13, %cst_7 [2] : vector<1x8x512xf32> to vector<1x8xf32>
    %15 = vector.shape_cast %14 : vector<1x8xf32> to vector<1x8x1xf32>
    %cst_8 = arith.constant 0.001953125 : f32
    %16 = vector.broadcast %cst_8 : f32 to vector<1x8x1xf32>
    %17 = arith.mulf %15, %16 : vector<1x8x1xf32>
    %18 = arith.mulf %12, %12 : vector<1x8x1xf32>
    %19 = arith.subf %17, %18 : vector<1x8x1xf32>
    %cst_9 = arith.constant 9.99999974E-6 : f32
    %20 = vector.broadcast %cst_9 : f32 to vector<1x8x1xf32>
    %21 = arith.addf %19, %20 : vector<1x8x1xf32>
    %22 = math.rsqrt %21 : vector<1x8x1xf32>
    %c0_10 = arith.constant 0 : index
    %c0_11 = arith.constant 0 : index
    %c0_12 = arith.constant 0 : index
    %23 = vector.load %arg3[%c0_10, %c0_11, %c0_12] : memref<1x8x512xf32, #tpu.memory_space<vmem>>, vector<1x8x512xf32>
    %c0_13 = arith.constant 0 : index
    %c0_14 = arith.constant 0 : index
    %c0_15 = arith.constant 0 : index
    %24 = vector.load %arg4[%c0_13, %c0_14, %c0_15] : memref<1x8x512xf32, #tpu.memory_space<vmem>>, vector<1x8x512xf32>
    %25 = vector.broadcast %22 : vector<1x8x1xf32> to vector<1x8x512xf32>
    %26 = arith.mulf %8, %25 : vector<1x8x512xf32>
    %27 = arith.mulf %26, %23 : vector<1x8x512xf32>
    %28 = arith.addf %27, %24 : vector<1x8x512xf32>
    %c0_16 = arith.constant 0 : index
    %c0_17 = arith.constant 0 : index
    %c0_18 = arith.constant 0 : index
    %29 = vector.load %arg5[%c0_16, %c0_17, %c0_18] : memref<1x8x512xf32, #tpu.memory_space<vmem>>, vector<1x8x512xf32>
    tpu.vector_store %arg5[%c0_16, %c0_17, %c0_18], %28 {strides = array<i32>} : memref<1x8x512xf32, #tpu.memory_space<vmem>>, vector<1x8x512xf32>,
    return
  }
  func.func @transform_0(%arg0: i32) -> (i32, i32, i32) {
    %c0_i32 = arith.constant 0 : i32
    %c0_i32_0 = arith.constant 0 : i32
    %c0_i32_1 = arith.constant 0 : i32
    return %arg0, %c0_i32, %c0_i32_0 : i32, i32, i32
  }
  func.func @transform_1(%arg0: i32) -> (i32, i32, i32) {
    %c0_i32 = arith.constant 0 : i32
    %c0_i32_0 = arith.constant 0 : i32
    %c0_i32_1 = arith.constant 0 : i32
    %c0_i32_2 = arith.constant 0 : i32
    return %c0_i32, %c0_i32_0, %c0_i32_1 : i32, i32, i32
  }
  func.func @transform_2(%arg0: i32) -> (i32, i32, i32) {
    %c0_i32 = arith.constant 0 : i32
    %c0_i32_0 = arith.constant 0 : i32
    %c0_i32_1 = arith.constant 0 : i32
    %c0_i32_2 = arith.constant 0 : i32
    return %c0_i32, %c0_i32_0, %c0_i32_1 : i32, i32, i32
  }
  func.func @transform_3(%arg0: i32) -> (i32, i32, i32) {
    %c0_i32 = arith.constant 0 : i32
    %c0_i32_0 = arith.constant 0 : i32
    %c0_i32_1 = arith.constant 0 : i32
    %c0_i32_2 = arith.constant 0 : i32
    return %c0_i32, %c0_i32_0, %c0_i32_1 : i32, i32, i32
  }
  func.func @transform_4(%arg0: i32) -> (i32, i32, i32) {
    %c0_i32 = arith.constant 0 : i32
    %c0_i32_0 = arith.constant 0 : i32
    %c0_i32_1 = arith.constant 0 : i32
    return %arg0, %c0_i32, %c0_i32_0 : i32, i32, i32
  }
}

</mosaic_0001>

<bundles_post_ra>
// kernel: tpu_custom_call.1
= control target key start
LH: loop header
LB: loop body
LE: loop exit
PB: predicated region body
PF: predicated region fallthrough
CT: control target
= control target key end

     0   :  { %9 = vsyncpa [#allocation3], 0  ;;  %s1046_s0 = inlined_call_operand.hbm [shape: f32[2,8,512], index: 0, kind: input, shape index: {}]   ;;  %s1047_s1 = inlined_call_operand.hbm [shape: f32[1,8,512], index: 1, kind: input, shape index: {}]   ;;  %s1048_s2 = inlined_call_operand.hbm [shape: f32[1,8,512], index: 2, kind: input, shape index: {}]   ;;  %s1049_s3 = inlined_call_operand.hbm [shape: f32[1,8,512], index: 3, kind: input, shape index: {}]   ;;  %s1050_s4 = inlined_call_operand.hbm [shape: f32[2,8,512], index: 4, kind: output, shape index: {}]  }
   0x1   :  { %11 = vsyncpa [#allocation3 + $0x1], 0 }
   0x2   :  { %12 = vsyncpa [#allocation6], 0 }
   0x3   :  { %13 = vsyncpa [#allocation9], 0 }
   0x4   :  { %14 = vsyncpa [#allocation4], 0 }
   0x5   :  { %16 = vsyncpa [#allocation4 + $0x1], 0  ;;  %s791_s15 = smov 0   ;;  %s793_s16 = smov 0  }
   0x6   :  { %s795_s17 = smov 0   ;;  %s797_s18 = smov 0  }
   0x7 LB: > { %s812_s19 = sadd.s32 4294967295, %s759_s18   ;;  %s450_s20 = sadd.s32 4294967294, %s759_s18   ;;  %s759_s18 = sphi %s797_s18, %s1073_s18   ;;  %s755_s17 = sphi %s795_s17, %s1072_s17   ;;  %s751_s16 = sphi %s793_s16, %s1071_s16   ;;  %s747_s15 = sphi %s791_s15, %s1070_s15  }
   0x8   : > { %p42_p0 = scmp.ne.s32.totalorder %s751_s16, %s747_s15  ;;  %p1051_p1 = scmp.eq.s32.totalorder %s812_s19, 0 }
   0x9   : > { %p135_p3 = scmp.eq.s32.totalorder %s450_s20, 1  ;;  %p451_p5 = scmp.ge.s32.totalorder %s759_s18, 1 }
   0xa   : > { %p821_p4 = por %p1051_p1, %p42_p0  ;;  %p142_p7 = scmp.lt.s32.totalorder %s759_s18, 3 }
   0xb   : > { %p826_p6 = por %p135_p3, %p42_p0  ;;  %s761_s24 = smov [#allocation5]  }
   0xc   : > { %s1054_s21 = scalar_select %p821_p4, 1, 0 }
   0xd   : > { %s1055_s22 = scalar_select %p826_p6, 1, 0 }
   0xe   : > { %p831_p8 = pnand %p451_p5, %p142_p7  ;;  %s155_s25 = sshll.u32 %s761_s24, 4  ;;  %s156_s25 = int_to_ptr.vmem [resolvable:$true] %s155_s25 }
   0xf   : > { %s762_s26 = smov [#allocation7]   ;;  %s763_s29 = smov [#allocation8]  }
  0x10   : > { %s1056_s23 = scalar_select %p831_p8, 1, 0 }
  0x11   : > { %p492_p10 = pneg %p831_p8  ;;  %s166_s27 = sshll.u32 %s762_s26, 4  ;;  %s844_s27 = int_to_ptr.vmem [resolvable:$true] %s166_s27 }
  0x12   : > { %s177_s30 = sshll.u32 %s763_s29, 4  ;;  %s571_s7 = scalar_lea.hbm %s1047_s1, 512  ;;  %s846_s30 = int_to_ptr.vmem [resolvable:$true] %s177_s30 }
  0x13   : > { %p840_p11 = pnand %p492_p10, %p1051_p1  ;;  %p572_p12 = scmp.ne.s32.totalorder %s1047_s1, %s571_s7 }
  0x14   : > { %p578_p5 = scmp.lt.u32.totalorder %s571_s7, %s1047_s1 }
  0x15   : > { %p856_p13 = pneg %p840_p11 }
  0x17   : > { %p574_p0 = pnand %p856_p13, %p572_p12 }
  0x19   : > { %p575_p3 = pneg %p574_p0 }
  0x1b   : > { %p580_p7 = pnand %p578_p5, %p575_p3 }
  0x1d   : > { %583 = shalt.err (!%p580_p7)
}
  0x1e   : > { %s584_s13 = scalar_lea.vmem %s156_s25, 512  ;;  %p592_p2 = scmp.lt.s32.totalorder %s156_s25, %s156_s25 }
  0x1f   : > { %p585_p10 = scmp.ne.s32.totalorder %s156_s25, %s584_s13  ;;  %p593_p6 = scmp.lt.s32.totalorder %s584_s13, %s584_s13 }
  0x21   : > { %p587_p9 = pnand %p585_p10, %p856_p13  ;;  %p594_p4 = por %p593_p6, %p592_p2 }
  0x23   : > { %p588_p1 = pneg %p587_p9 }
  0x25   : > { %p595_p8 = pnand %p594_p4, %p588_p1 }
  0x27   : > { %598 = shalt.err (!%p595_p8)
}
  0x28   : > { %495 = dma.hbm_to_vmem [thread:$0]  (!%p840_p11), %s1047_s1, 512, %s156_s25, [#allocation6]  }
  0x29   : > { %s599_s29 = scalar_lea.hbm %s1048_s2, 512 }
  0x2a   : > { %p600_p9 = scmp.ne.s32.totalorder %s1048_s2, %s599_s29  ;;  %p606_p1 = scmp.lt.u32.totalorder %s599_s29, %s1048_s2 }
  0x2c   : > { %p602_p12 = pnand %p600_p9, %p856_p13 }
  0x2e   : > { %p603_p2 = pneg %p602_p12 }
  0x30   : > { %p608_p4 = pnand %p606_p1, %p603_p2 }
  0x32   : > { %611 = shalt.err (!%p608_p4)
}
  0x33   : > { %s612_s25 = scalar_lea.vmem %s844_s27, 512  ;;  %p620_p3 = scmp.lt.s32.totalorder %s844_s27, %s844_s27 }
  0x34   : > { %p613_p6 = scmp.ne.s32.totalorder %s844_s27, %s612_s25  ;;  %p621_p5 = scmp.lt.s32.totalorder %s612_s25, %s612_s25 }
  0x36   : > { %p615_p8 = pnand %p613_p6, %p856_p13  ;;  %p622_p7 = por %p621_p5, %p620_p3 }
  0x38   : > { %p616_p0 = pneg %p615_p8 }
  0x3a   : > { %p623_p10 = pnand %p622_p7, %p616_p0 }
  0x3c   : > { %626 = shalt.err (!%p623_p10)
}
  0x3d   : > { %498 = dma.hbm_to_vmem [thread:$0]  (!%p840_p11), %s1048_s2, 512, %s844_s27, [#allocation6]  }
  0x3e   : > { %s627_s14 = scalar_lea.hbm %s1049_s3, 512 }
  0x3f   : > { %p628_p9 = scmp.ne.s32.totalorder %s1049_s3, %s627_s14  ;;  %p634_p1 = scmp.lt.u32.totalorder %s627_s14, %s1049_s3 }
  0x41   : > { %p630_p12 = pnand %p628_p9, %p856_p13 }
  0x43   : > { %p631_p2 = pneg %p630_p12 }
  0x45   : > { %p636_p4 = pnand %p634_p1, %p631_p2 }
  0x47   : > { %639 = shalt.err (!%p636_p4)
}
  0x48   : > { %s640_s27 = scalar_lea.vmem %s846_s30, 512  ;;  %p648_p3 = scmp.lt.s32.totalorder %s846_s30, %s846_s30 }
  0x49   : > { %p641_p6 = scmp.ne.s32.totalorder %s846_s30, %s640_s27  ;;  %p649_p5 = scmp.lt.s32.totalorder %s640_s27, %s640_s27 }
  0x4b   : > { %p643_p8 = pnand %p641_p6, %p856_p13  ;;  %p650_p7 = por %p649_p5, %p648_p3 }
  0x4d   : > { %p644_p0 = pneg %p643_p8 }
  0x4f   : > { %p651_p10 = pnand %p650_p7, %p644_p0 }
  0x51   : > { %654 = shalt.err (!%p651_p10)
}
  0x52   : > { %501 = dma.hbm_to_vmem [thread:$0]  (!%p840_p11), %s1049_s3, 512, %s846_s30, [#allocation9]  }
  0x53   : > { %s919_s10 = sadd.s32 1, %s759_s18   ;;  %s29_s7 = sadd.s32 1, %s755_s17 }
  0x54   : > { %s26_s28 = ssub.s32 %s759_s18, %s919_s10  ;;  %p36_p9 = scmp.ne.s32.totalorder %s755_s17, %s751_s16 }
  0x55   : > { %p27_p13 = scmp.eq.s32.totalorder %s26_s28, 0  ;;  %p37_p12 = scmp.eq.s32.totalorder %s759_s18, 0 }
  0x56   : > { %p513_p2 = scmp.lt.s32.totalorder %s759_s18, 2  ;;  %p1059_p4 = scmp.eq.s32.totalorder %s812_s19, 1 }
  0x57   : > { %s929_s8 = scalar_select %p27_p13, %s755_s17, %s29_s7  }
  0x58   : > { %p38_p1 = por %p37_p12, %p36_p9  ;;  %p933_p6 = por %p1059_p4, %p36_p9 }
  0x59   : > { %s188_s9 = sand.u32 1, %s755_s17   ;;  %s474_s11 = sshll.u32 %s759_s18, 9 }
  0x5a   : > { %s456_s30 = sshll.u32 %s188_s9, 5  ;;  %s942_s14 = scalar_lea.hbm %s1046_s0, %s474_s11 }
  0x5b   : > { %s192_s20 = scalar_lea.vmem [#allocation2], %s456_s30  ;;  %p944_p11 = pnand %p513_p2, %p38_p1 }
  0x5c   : > { %s200_s24 = sshll.u32 %s192_s20, 4  ;;  %s189_s29 = scalar_lea.sflag [#allocation3], %s188_s9  ;;  %s948_s24 = int_to_ptr.vmem [resolvable:$true] %s200_s24 }
  0x5d   : > { %s655_s27 = scalar_lea.hbm %s942_s14, 512  ;;  %p657_p0 = pneg %p944_p11 }
  0x5e   : > { %p656_p8 = scmp.ne.s32.totalorder %s942_s14, %s655_s27  ;;  %s660_s28 = scalar_lea.hbm %s1046_s0, 1024 }
  0x5f   : > { %p661_p7 = scmp.lt.u32.totalorder %s942_s14, %s1046_s0  ;;  %p662_p10 = scmp.lt.u32.totalorder %s660_s28, %s655_s27 }
  0x60   : > { %p658_p3 = pnand %p657_p0, %p656_p8  ;;  %p664_p9 = scmp.lt.u32.totalorder %s655_s27, %s942_s14 }
  0x61   : > { %p663_p13 = por %p662_p10, %p661_p7 }
  0x62   : > { %p659_p5 = pneg %p658_p3 }
  0x63   : > { %p665_p12 = por %p664_p9, %p663_p13 }
  0x65   : > { %p666_p2 = pnand %p665_p12, %p659_p5 }
  0x67   : > { %669 = shalt.err (!%p666_p2)
}
  0x68   : > { %s670_s9 = scalar_lea.vmem %s948_s24, 512  ;;  %s764_s30 = smov [#allocation2]  }
  0x69   : > { %p671_p1 = scmp.ne.s32.totalorder %s948_s24, %s670_s9  ;;  %s675_s12 = sshll.u32 %s764_s30, 4  ;;  %s676_s12 = int_to_ptr.vmem [resolvable:$false] %s675_s12 }
  0x6a   : > { %s677_s13 = scalar_lea.vmem %s676_s12, 1024  ;;  %p678_p3 = scmp.lt.s32.totalorder %s948_s24, %s676_s12 }
  0x6b   : > { %p673_p4 = pnand %p671_p1, %p657_p0  ;;  %p679_p7 = scmp.lt.s32.totalorder %s677_s13, %s670_s9 }
  0x6d   : > { %p674_p8 = pneg %p673_p4  ;;  %p680_p10 = por %p679_p7, %p678_p3 }
  0x6f   : > { %p681_p13 = pnand %p680_p10, %p674_p8 }
  0x71   : > { %684 = shalt.err (!%p681_p13)
}
  0x72   : > { %505 = dma.hbm_to_vmem [thread:$0]  (!%p944_p11), %s942_s14, 512, %s948_s24, %s189_s29  }
  0x73   : > { %p1062_p5 = scmp.ne.s32.totalorder %s1056_s23, 0 }
  0x74   : > { %s978_s20 = sand.u32 (!%p1062_p5), 1, %s751_s16   ;;  %p1063_p0 = scmp.ne.s32.totalorder (!%p1062_p5), %s1054_s21, 0 }
  0x75   : > { %209 = sbr.rel (%p1062_p5) target bundleno = 323 (0x143), region = 36  ;;  %s460_s27 = sshll.u32 (!%p1062_p5), %s978_s20, 5 }
  0x76   : > { %s212_s5 = scalar_lea.sflag (!%p1062_p5), [#allocation3], %s978_s20  ;;  %s215_s6 = scalar_lea.vmem (!%p1062_p5), [#allocation2], %s460_s27 }
  0x7c   : > { %730 = dma.done.wait (%p1063_p0), %s212_s5, 512  }
  0x7d   : > { %732 = vsyncadd (%p1063_p0), %s212_s5, 4294966784  ;;  %p1064_p11 = scmp.eq.s32.totalorder %s812_s19, 0 }
  0x7f   : > { %734 = dma.done.wait (%p1064_p11), [#allocation6], 1024   ;;  %p1065_p9 = pmov %p1064_p11 }
  0x81   : > { %736 = vsyncadd (%p1065_p9), [#allocation6], 4294966272  ;;  %p1066_p12 = pmov %p1065_p9 }
  0x82   : > { %p1067_p2 = pmov %p1065_p9 }
  0x83   : > { %738 = dma.done.wait (%p1066_p12), [#allocation9], 512  }
  0x84   : > { %740 = vsyncadd (%p1067_p2), [#allocation9], 4294966784  ;;  %v252_v0 = vld [vmem:[%s215_s6] sm:$0xff]  ;;  %v253_v1 = vld [vmem:[%s215_s6 + $0x8] sm:$0xff]  ;;  %s475_s21 = sshll.u32 %s812_s19, 9  ;;  %s251_s23 = scalar_lea.vmem [#allocation10], %s460_s27 }
  0x85   : > { %v254_v2 = vld [vmem:[%s215_s6 + $0x10] sm:$0xff]  ;;  %v292_v3 = vadd.f32 %v253_v1, %v252_v0  ;;  %v298_v4 = vmul.f32 %v252_v0, %v252_v0  ;;  %v299_v5 = vmul.f32 %v253_v1, %v253_v1  ;;  %v255_v7 = vld [vmem:[%s215_s6 + $0x18] sm:$0xff]  ;;  %v257_v14 = vld [vmem:[#allocation5 + $0x8] sm:$0xff]  ;;  %s351_s14 = sshll.u32 %s251_s23, 4  ;;  %s1002_s29 = scalar_lea.hbm %s1050_s4, %s475_s21  ;;  %s1004_s14 = int_to_ptr.vmem [resolvable:$true] %s351_s14 }
  0x86   : > { %v300_v6 = vmul.f32 %v254_v2, %v254_v2  ;;  %v301_v9 = vmul.f32 %v255_v7, %v255_v7  ;;  %v258_v15 = vld [vmem:[#allocation5 + $0x10] sm:$0xff]  ;;  %v259_v16 = vld [vmem:[#allocation5 + $0x18] sm:$0xff]  ;;  %v256_v17 = vld [vmem:[#allocation5] sm:$0xff]  ;;  %v261_v18 = vmul.f32 %v257_v14, %v253_v1  ;;  %s337_s19 = scalar_lea.sflag [#allocation4], %s978_s20  ;;  %s685_s28 = scalar_lea.vmem %s1004_s14, 512 }
  0x87   : > { %v293_v8 = vadd.f32 %v292_v3, %v254_v2  ;;  %v302_v10 = vadd.f32 %v299_v5, %v298_v4  ;;  %v262_v19 = vmul.f32 %v258_v15, %v254_v2  ;;  %v263_v20 = vmul.f32 %v259_v16, %v255_v7  ;;  %v312_v49 = vld [vmem:[#allocation7] sm:$0xff]  ;;  %v313_v51 = vld [vmem:[#allocation7 + $0x8] sm:$0xff]  ;;  %v314_v52 = vld [vmem:[#allocation7 + $0x10] sm:$0xff]  ;;  %p686_p1 = scmp.ne.s32.totalorder %s1004_s14, %s685_s28  ;;  %s765_s7 = smov [#allocation10]  }
  0x88   : > { %v260_v21 = vmul.f32 %v256_v17, %v252_v0  ;;  %v466_v22 = vmul.f32 -1.442695, %v261_v18  ;;  %v315_v53 = vld [vmem:[#allocation7 + $0x18] sm:$0xff]  ;;  %v316_v54 = vld [vmem:[#allocation8] sm:$0xff]  ;;  %v317_v59 = vld [vmem:[#allocation8 + $0x8] sm:$0xff]  ;;  %s689_s11 = sshll.u32 %s765_s7, 4  ;;  %s690_s11 = int_to_ptr.vmem [resolvable:$false] %s689_s11 }
  0x89   : > { %v294_v11 = vadd.f32 %v293_v8, %v255_v7  ;;  %v303_v12 = vadd.f32 %v302_v10, %v300_v6  ;;  %v467_v23 = vmul.f32 -1.442695, %v262_v19  ;;  %v468_v24 = vmul.f32 -1.442695, %v263_v20  ;;  %v318_v60 = vld [vmem:[#allocation8 + $0x10] sm:$0xff]  ;;  %v319_v61 = vld [vmem:[#allocation8 + $0x18] sm:$0xff]  ;;  %p687_p4 = pnand %p686_p1, %p933_p6  ;;  %p692_p3 = scmp.lt.s32.totalorder %s1004_s14, %s690_s11 }
  0x8a   : > { %v465_v25 = vmul.f32 -1.442695, %v260_v21  ;;  %553 = vpow2.f32 %v466_v22  ;;  %s691_s9 = scalar_lea.vmem %s690_s11, 1024 }
  0x8b   : > { %295 = vadd.xlane.f32.xlu0 %v294_v11  ;;  %v304_v13 = vadd.f32 %v303_v12, %v301_v9  ;;  %555 = vpow2.f32 %v467_v23  ;;  %p688_p8 = pneg %p687_p4  ;;  %p693_p7 = scmp.lt.s32.totalorder %s691_s9, %s685_s28 }
  0x8c   : > { %557 = vpow2.f32 %v468_v24 }
  0x8d   : > { %559 = vpow2.f32 %v465_v25  ;;  %p694_p10 = por %p693_p7, %p692_p3 }
  0x8f   : > { %305 = vadd.xlane.f32.xlu0 %v304_v13  ;;  %p695_p13 = pnand %p694_p10, %p688_p8 }
  0x94   : > { %v554_v26 = vpop.eup %553 }
  0x95   : > { %v556_v27 = vpop.eup %555  ;;  %v277_v30 = vadd.f32 1.0, %v554_v26 }
  0x96   : > { %v558_v28 = vpop.eup %557  ;;  %v278_v31 = vadd.f32 1.0, %v556_v27 }
  0x97   : > { %v560_v29 = vpop.eup %559  ;;  %v279_v32 = vadd.f32 1.0, %v558_v28  ;;  %561 = vrcp.f32 %v277_v30 }
  0x98   : > { %v276_v34 = vadd.f32 1.0, %v560_v29  ;;  %563 = vrcp.f32 %v278_v31 }
  0x99   : > { %565 = vrcp.f32 %v279_v32 }
  0x9a   : > { %567 = vrcp.f32 %v276_v34 }
  0xa1   : > { %v562_v41 = vpop.eup %561 }
  0xa2   : > { %v564_v42 = vpop.eup %563  ;;  %v289_v45 = vmul.f32 %v562_v41, %v253_v1 }
  0xa3   : > { %v566_v43 = vpop.eup %565  ;;  %v290_v46 = vmul.f32 %v564_v42, %v254_v2 }
  0xa4   : > { %v568_v44 = vpop.eup %567  ;;  %v291_v47 = vmul.f32 %v566_v43, %v255_v7 }
  0xa5   : > { %v288_v48 = vmul.f32 %v568_v44, %v252_v0 }
 0x118   : > { %v296_v33 = vpop.xlane.xlu0 %295 }
 0x119   : > { %v297_v35 = vmul.f32 0.001953125, %v296_v33 }
 0x11b   : > { %v308_v37 = vmul.f32 %v297_v35, %v297_v35 }
 0x11c   : > { %v306_v36 = vpop.xlane.xlu0 %305 }
 0x11d   : > { %v307_v38 = vmul.f32 0.001953125, %v306_v36 }
 0x11f   : > { %v309_v39 = vsub.f32 %v307_v38, %v308_v37 }
 0x121   : > { %v310_v40 = vadd.f32 1e-05, %v309_v39 }
 0x123   : > { %569 = vrsqrt.f32 %v310_v40 }
 0x12d   : > { %v570_v50 = vpop.eup %569 }
 0x12e   : > { %v320_v55 = vmul.f32 %v570_v50, %v288_v48  ;;  %v321_v56 = vmul.f32 %v570_v50, %v289_v45  ;;  %v322_v57 = vmul.f32 %v570_v50, %v290_v46  ;;  %v323_v58 = vmul.f32 %v570_v50, %v291_v47 }
 0x130   : > { %v324_v62 = vmul.f32 %v320_v55, %v312_v49  ;;  %v325_v63 = vmul.f32 %v321_v56, %v313_v51  ;;  %v326_v0 = vmul.f32 %v322_v57, %v314_v52  ;;  %v327_v1 = vmul.f32 %v323_v58, %v315_v53 }
 0x132   : > { %v328_v2 = vadd.f32 %v324_v62, %v316_v54  ;;  %v329_v3 = vadd.f32 %v325_v63, %v317_v59  ;;  %v330_v4 = vadd.f32 %v326_v0, %v318_v60  ;;  %v331_v5 = vadd.f32 %v327_v1, %v319_v61 }
 0x134   : > { %332 = vst [vmem:[%s251_s23] sm:$0xff] %v328_v2  ;;  %333 = vst [vmem:[%s251_s23 + $0x8] sm:$0xff] %v329_v3 }
 0x135   : > { %334 = vst [vmem:[%s251_s23 + $0x10] sm:$0xff] %v330_v4  ;;  %335 = vst [vmem:[%s251_s23 + $0x18] sm:$0xff] %v331_v5 }
 0x136   : > { %698 = shalt.err (!%p695_p13)
}
 0x137   : > { %s699_s30 = scalar_lea.hbm %s1002_s29, 512  ;;  %s703_s20 = scalar_lea.hbm %s1050_s4, 1024 }
 0x138   : > { %p700_p5 = scmp.ne.s32.totalorder %s1002_s29, %s699_s30  ;;  %p704_p9 = scmp.lt.u32.totalorder %s1002_s29, %s1050_s4 }
 0x139   : > { %p705_p12 = scmp.lt.u32.totalorder %s703_s20, %s699_s30  ;;  %p707_p1 = scmp.lt.u32.totalorder %s699_s30, %s1002_s29 }
 0x13a   : > { %p701_p0 = pnand %p700_p5, %p933_p6 }
 0x13b   : > { %p706_p2 = por %p705_p12, %p704_p9 }
 0x13c   : > { %p702_p11 = pneg %p701_p0 }
 0x13d   : > { %p708_p4 = por %p707_p1, %p706_p2 }
 0x13f   : > { %p709_p8 = pnand %p708_p4, %p702_p11 }
 0x141   : > { %712 = shalt.err (!%p709_p8)
}
 0x142   : > { %490 = dma.vmem_to_hbm [thread:$0]  (%p933_p6), %s1004_s14, 512, %s1002_s29, %s337_s19  }
 0x143 PF: > { %s363_s6 = sand.u32 1, %s747_s15   ;;  %p1068_p3 = scmp.ne.s32.totalorder %s1055_s22, 0 }
 0x144   : > { %p1069_p7 = scmp.ge.s32.totalorder %s759_s18, 2  ;;  %s364_s21 = scalar_lea.sflag [#allocation4], %s363_s6 }
 0x146   : > { %p507_p10 = pnand %p1069_p7, %p1068_p3 }
 0x148   : > { %742 = dma.done.wait (!%p507_p10), %s364_s21, 512  }
 0x149   : > { %744 = vsyncadd (!%p507_p10), %s364_s21, 4294966784  ;;  %p19_p13 = scmp.ge.s32.totalorder %s919_s10, 4   ;;  %s1070_s15 = smov %s751_s16 }
 0x14a   : > { %s1071_s16 = smov %s755_s17  ;;  %s1072_s17 = smov %s929_s8 }
 0x14b   : > { %s1073_s18 = smov %s919_s10  ;;  %21 = sbr.rel (!%p19_p13) target bundleno = 7 (0x7), region = 93 }
 0x152   :  { %369 = vsyncpa [#allocation3], 1 }
 0x153   :  { %371 = vsyncpa [#allocation3 + $0x1], 1 }
 0x154   :  { %372 = vsyncpa [#allocation6], 1 }
 0x155   :  { %373 = vsyncpa [#allocation9], 1 }
 0x156   :  { %374 = vsyncpa [#allocation4], 1 }
 0x157   :  { %376 = vsyncpa [#allocation4 + $0x1], 1 }

</bundles_post_ra>
